<compile_context>
chip_gen: v6e
topology: v6e:2x2x1
jax: 0.10.0
libtpu: 0.0.40
codegen_flags: <defaults>
</compile_context>

<pallas_src>
import functools

import jax
import jax.numpy as jnp
from jax import lax
from jax.experimental import pallas as pl
from jax.experimental.pallas import tpu as pltpu


def _choose_row_tile(H, W):
    """Smallest TH that divides H, satisfies the sublane rule (TH % 8 == 0 or
    TH == H), and keeps the pointwise matmul M-dim (TH*W) >= 128 if possible."""
    for th in range(1, H + 1):
        if H % th:
            continue
        if th % 8 and th != H:
            continue
        if th * W >= 128:
            return th
    return H


def _dsc_kernel(x_ref, dw_ref, pw_ref, pb_ref, o_ref, *,
                TH, W, ks, dil, c_in, c_out):
    """One (batch, row-tile) per grid step.

    x_ref : (1, Hp, Wp, C_in)   spatially pre-padded ('same') image for batch b
    dw_ref: (ks, ks, C_in)      depthwise weights (per-channel)
    pw_ref: (C_in, C_out)       pointwise (1x1) weights
    pb_ref: (1, C_out)          effective pointwise bias (depthwise bias folded in)
    o_ref : (1, TH, W, C_out)   output row tile
    """
    th = pl.program_id(1)
    r0 = pl.multiple_of(th * TH, TH)          # first output row of this tile

    # Hoist all ks*ks per-channel tap weights out of the accumulation loop
    # (JAX does not CSE broadcast_in_dim).
    taps = [[dw_ref[kh, kw, :].astype(jnp.float32) for kw in range(ks)]
            for kh in range(ks)]

    # ---- depthwise conv on the row tile: shift-and-MAC over ks*ks taps ----
    acc = jnp.zeros((TH, W, c_in), jnp.float32)
    for kh in range(ks):
        # load the (TH, Wp, C_in) row slab for this kh once, shift along W below
        rows = x_ref[0, pl.ds(r0 + kh * dil, TH), :, :].astype(jnp.float32)
        for kw in range(ks):
            acc = acc + rows[:, kw * dil:kw * dil + W, :] * taps[kh][kw]

    # ---- fused pointwise 1x1 conv: (TH*W, C_in) @ (C_in, C_out) on the MXU ----
    y = jnp.dot(acc.reshape(TH * W, c_in),
                pw_ref[...].astype(jnp.float32),
                preferred_element_type=jnp.float32)
    y = y + pb_ref[0, :]
    o_ref[0] = y.reshape(TH, W, c_out).astype(o_ref.dtype)


def depthwise_separable_conv(x_nchw, dw, db, pw, pb, *, ks, dil=1):
    """x_nchw: (B, C_in, H, W) float32.  Returns (B, C_out, H, W)."""
    B, c_in, H, W = x_nchw.shape
    c_out = pw.shape[1]

    # 'same' padding (odd kernel => symmetric, matches PyTorch padding='same')
    pad = dil * (ks - 1)
    pad_lo, pad_hi = pad // 2, pad - pad // 2

    # Fold the depthwise bias into the pointwise bias (pointwise conv is linear):
    #   pw(dw(x) + db) + pb == pw(dw(x)) + (db @ pw + pb)
    pb_eff = pb + db @ pw                      # (1, c_out)

    # glue: NCHW -> NHWC, spatial pad
    x = jnp.transpose(x_nchw, (0, 2, 3, 1))
    x = jnp.pad(x, ((0, 0), (pad_lo, pad_hi), (pad_lo, pad_hi), (0, 0)))
    Hp, Wp = H + pad, W + pad

    TH = _choose_row_tile(H, W)
    n_th = H // TH

    kernel = functools.partial(_dsc_kernel, TH=TH, W=W, ks=ks, dil=dil,
                               c_in=c_in, c_out=c_out)

    out_nhwc = pl.pallas_call(
        kernel,
        out_shape=jax.ShapeDtypeStruct((B, H, W, c_out), x_nchw.dtype),
        grid_spec=pltpu.PrefetchScalarGridSpec(
            num_scalar_prefetch=0,
            grid=(B, n_th),
            in_specs=[
                # full padded image per batch (re-used across row tiles, only
                # re-DMA'd when b changes); halo rows sliced in-kernel.
                pl.BlockSpec((1, Hp, Wp, c_in), lambda b, t: (b, 0, 0, 0)),
                pl.BlockSpec((ks, ks, c_in), lambda b, t: (0, 0, 0)),
                pl.BlockSpec((c_in, c_out), lambda b, t: (0, 0)),
                pl.BlockSpec((1, c_out), lambda b, t: (0, 0)),
            ],
            out_specs=pl.BlockSpec((1, TH, W, c_out), lambda b, t: (b, t, 0, 0)),
        ),
        compiler_params=pltpu.CompilerParams(
            dimension_semantics=("parallel", "parallel"),
            vmem_limit_bytes=32 * 1024 * 1024,
        ),
    )(x, dw, pw, pb_eff)

    return jnp.transpose(out_nhwc, (0, 3, 1, 2))  # back to NCHW


def _reference(x_nchw, dw, db, pw, pb, *, ks, dil):
    """Pure-JAX reference (lax conv) mirroring nn.Conv2d semantics."""
    B, c_in, H, W = x_nchw.shape
    c_out = pw.shape[1]
    # depthwise: weights (ks, ks, c_in) -> OIHW (c_in, 1, ks, ks)
    w_dw = jnp.transpose(dw, (2, 0, 1))[:, None, :, :]
    pad = dil * (ks - 1)
    pads = ((pad // 2, pad - pad // 2),) * 2
    y = lax.conv_general_dilated(
        x_nchw, w_dw, window_strides=(1, 1), padding=pads,
        rhs_dilation=(dil, dil), feature_group_count=c_in,
        dimension_numbers=("NCHW", "OIHW", "NCHW"))
    y = y + db.reshape(1, c_in, 1, 1)
    # pointwise: (c_in, c_out) -> OIHW (c_out, c_in, 1, 1)
    w_pw = jnp.transpose(pw, (1, 0))[:, :, None, None]
    z = lax.conv_general_dilated(
        y, w_pw, window_strides=(1, 1), padding="VALID",
        dimension_numbers=("NCHW", "OIHW", "NCHW"))
    return z + pb.reshape(1, c_out, 1, 1)


if __name__ == "__main__":
    key = jax.random.PRNGKey(0)
    B, C_IN, C_OUT, H, W = 2, 4, 8, 16, 16
    KS, DIL = 3, 1

    k1, k2, k3, k4, k5 = jax.random.split(key, 5)
    x = jax.random.normal(k1, (B, C_IN, H, W), jnp.float32)
    # depthwise conv params: PyTorch weight (C_in, 1, ks, ks) -> stored (ks, ks, C_in)
    dw = jax.random.normal(k2, (KS, KS, C_IN), jnp.float32) * 0.2
    db = jax.random.normal(k3, (1, C_IN), jnp.float32) * 0.1
    # pointwise conv params: PyTorch weight (C_out, C_in, 1, 1) -> stored (C_in, C_out)
    pw = jax.random.normal(k4, (C_IN, C_OUT), jnp.float32) * 0.2
    pb = jax.random.normal(k5, (1, C_OUT), jnp.float32) * 0.1

    out = depthwise_separable_conv(x, dw, db, pw, pb, ks=KS, dil=DIL)
    out = jax.block_until_ready(out)

    ref = _reference(x, dw, db, pw, pb, ks=KS, dil=DIL)
    assert out.shape == (B, C_OUT, H, W)
    assert jnp.allclose(out, ref, atol=1e-4, rtol=1e-4), "mismatch vs reference"

    print("KERNEL_OK")
</pallas_src>

<mosaic_0001>
module attributes {stable_mosaic.version = 11 : i64} {
  func.func @_dsc_kernel(%arg0: i32, %arg1: i32, %arg2: memref<1x18x18x4xf32, #tpu.memory_space<vmem>>, %arg3: memref<3x3x4xf32, #tpu.memory_space<vmem>>, %arg4: memref<4x8xf32, #tpu.memory_space<vmem>>, %arg5: memref<1x8xf32, #tpu.memory_space<vmem>>, %arg6: memref<1x8x16x8xf32, #tpu.memory_space<vmem>>) attributes {dimension_semantics = [#tpu.dimension_semantics<parallel>, #tpu.dimension_semantics<parallel>], iteration_bounds = array<i64: 2, 2>, scalar_prefetch = 0 : i64, scratch_operands = 0 : i64, tpu.core_type = #tpu.core_type<tc>, window_params = [{transform_indices = @transform_0, window_bounds = array<i64: 1, 18, 18, 4>}, {pipeline_mode = #tpu.pipeline_mode<synchronous>, transform_indices = @transform_1, window_bounds = array<i64: 3, 3, 4>}, {pipeline_mode = #tpu.pipeline_mode<synchronous>, transform_indices = @transform_2, window_bounds = array<i64: 4, 8>}, {pipeline_mode = #tpu.pipeline_mode<synchronous>, transform_indices = @transform_3, window_bounds = array<i64: 1, 8>}, {transform_indices = @transform_4, window_bounds = array<i64: 1, 8, 16, 8>}]} {
    %c8_i32 = arith.constant 8 : i32
    %0 = arith.muli %arg1, %c8_i32 : i32
    %1 = tpu.assume_multiple %0, 8 : i32
    %c0 = arith.constant 0 : index
    %c0_0 = arith.constant 0 : index
    %c0_1 = arith.constant 0 : index
    %2 = vector.load %arg3[%c0, %c0_0, %c0_1] : memref<3x3x4xf32, #tpu.memory_space<vmem>>, vector<1x1x4xf32>
    %3 = vector.shape_cast %2 : vector<1x1x4xf32> to vector<4xf32>
    %c0_2 = arith.constant 0 : index
    %c1 = arith.constant 1 : index
    %c0_3 = arith.constant 0 : index
    %4 = vector.load %arg3[%c0_2, %c1, %c0_3] : memref<3x3x4xf32, #tpu.memory_space<vmem>>, vector<1x1x4xf32>
    %5 = vector.shape_cast %4 : vector<1x1x4xf32> to vector<4xf32>
    %c0_4 = arith.constant 0 : index
    %c2 = arith.constant 2 : index
    %c0_5 = arith.constant 0 : index
    %6 = vector.load %arg3[%c0_4, %c2, %c0_5] : memref<3x3x4xf32, #tpu.memory_space<vmem>>, vector<1x1x4xf32>
    %7 = vector.shape_cast %6 : vector<1x1x4xf32> to vector<4xf32>
    %c1_6 = arith.constant 1 : index
    %c0_7 = arith.constant 0 : index
    %c0_8 = arith.constant 0 : index
    %8 = vector.load %arg3[%c1_6, %c0_7, %c0_8] : memref<3x3x4xf32, #tpu.memory_space<vmem>>, vector<1x1x4xf32>
    %9 = vector.shape_cast %8 : vector<1x1x4xf32> to vector<4xf32>
    %c1_9 = arith.constant 1 : index
    %c1_10 = arith.constant 1 : index
    %c0_11 = arith.constant 0 : index
    %10 = vector.load %arg3[%c1_9, %c1_10, %c0_11] : memref<3x3x4xf32, #tpu.memory_space<vmem>>, vector<1x1x4xf32>
    %11 = vector.shape_cast %10 : vector<1x1x4xf32> to vector<4xf32>
    %c1_12 = arith.constant 1 : index
    %c2_13 = arith.constant 2 : index
    %c0_14 = arith.constant 0 : index
    %12 = vector.load %arg3[%c1_12, %c2_13, %c0_14] : memref<3x3x4xf32, #tpu.memory_space<vmem>>, vector<1x1x4xf32>
    %13 = vector.shape_cast %12 : vector<1x1x4xf32> to vector<4xf32>
    %c2_15 = arith.constant 2 : index
    %c0_16 = arith.constant 0 : index
    %c0_17 = arith.constant 0 : index
    %14 = vector.load %arg3[%c2_15, %c0_16, %c0_17] : memref<3x3x4xf32, #tpu.memory_space<vmem>>, vector<1x1x4xf32>
    %15 = vector.shape_cast %14 : vector<1x1x4xf32> to vector<4xf32>
    %c2_18 = arith.constant 2 : index
    %c1_19 = arith.constant 1 : index
    %c0_20 = arith.constant 0 : index
    %16 = vector.load %arg3[%c2_18, %c1_19, %c0_20] : memref<3x3x4xf32, #tpu.memory_space<vmem>>, vector<1x1x4xf32>
    %17 = vector.shape_cast %16 : vector<1x1x4xf32> to vector<4xf32>
    %c2_21 = arith.constant 2 : index
    %c2_22 = arith.constant 2 : index
    %c0_23 = arith.constant 0 : index
    %18 = vector.load %arg3[%c2_21, %c2_22, %c0_23] : memref<3x3x4xf32, #tpu.memory_space<vmem>>, vector<1x1x4xf32>
    %19 = vector.shape_cast %18 : vector<1x1x4xf32> to vector<4xf32>
    %cst = arith.constant 0.000000e+00 : f32
    %20 = vector.broadcast %cst : f32 to vector<8x16x4xf32>
    %c0_i32 = arith.constant 0 : i32
    %21 = arith.addi %1, %c0_i32 : i32
    %c0_24 = arith.constant 0 : index
    %22 = arith.index_cast %21 : i32 to index
    %c0_25 = arith.constant 0 : index
    %c0_26 = arith.constant 0 : index
    %23 = vector.load %arg2[%c0_24, %22, %c0_25, %c0_26] : memref<1x18x18x4xf32, #tpu.memory_space<vmem>>, vector<1x8x18x4xf32>
    %24 = vector.shape_cast %23 : vector<1x8x18x4xf32> to vector<8x18x4xf32>
    %25 = vector.extract_strided_slice %24 {offsets = [0, 0, 0], sizes = [8, 16, 4], strides = [1, 1, 1]} : vector<8x18x4xf32> to vector<8x16x4xf32>
    %26 = vector.shape_cast %3 : vector<4xf32> to vector<1x1x4xf32>
    %27 = vector.broadcast %26 : vector<1x1x4xf32> to vector<8x16x4xf32>
    %28 = arith.mulf %25, %27 : vector<8x16x4xf32>
    %29 = arith.addf %20, %28 : vector<8x16x4xf32>
    %30 = vector.extract_strided_slice %24 {offsets = [0, 1, 0], sizes = [8, 16, 4], strides = [1, 1, 1]} : vector<8x18x4xf32> to vector<8x16x4xf32>
    %31 = vector.shape_cast %5 : vector<4xf32> to vector<1x1x4xf32>
    %32 = vector.broadcast %31 : vector<1x1x4xf32> to vector<8x16x4xf32>
    %33 = arith.mulf %30, %32 : vector<8x16x4xf32>
    %34 = arith.addf %29, %33 : vector<8x16x4xf32>
    %35 = vector.extract_strided_slice %24 {offsets = [0, 2, 0], sizes = [8, 16, 4], strides = [1, 1, 1]} : vector<8x18x4xf32> to vector<8x16x4xf32>
    %36 = vector.shape_cast %7 : vector<4xf32> to vector<1x1x4xf32>
    %37 = vector.broadcast %36 : vector<1x1x4xf32> to vector<8x16x4xf32>
    %38 = arith.mulf %35, %37 : vector<8x16x4xf32>
    %39 = arith.addf %34, %38 : vector<8x16x4xf32>
    %c1_i32 = arith.constant 1 : i32
    %40 = arith.addi %1, %c1_i32 : i32
    %c0_27 = arith.constant 0 : index
    %41 = arith.index_cast %40 : i32 to index
    %c0_28 = arith.constant 0 : index
    %c0_29 = arith.constant 0 : index
    %42 = vector.load %arg2[%c0_27, %41, %c0_28, %c0_29] : memref<1x18x18x4xf32, #tpu.memory_space<vmem>>, vector<1x8x18x4xf32>
    %43 = vector.shape_cast %42 : vector<1x8x18x4xf32> to vector<8x18x4xf32>
    %44 = vector.extract_strided_slice %43 {offsets = [0, 0, 0], sizes = [8, 16, 4], strides = [1, 1, 1]} : vector<8x18x4xf32> to vector<8x16x4xf32>
    %45 = vector.shape_cast %9 : vector<4xf32> to vector<1x1x4xf32>
    %46 = vector.broadcast %45 : vector<1x1x4xf32> to vector<8x16x4xf32>
    %47 = arith.mulf %44, %46 : vector<8x16x4xf32>
    %48 = arith.addf %39, %47 : vector<8x16x4xf32>
    %49 = vector.extract_strided_slice %43 {offsets = [0, 1, 0], sizes = [8, 16, 4], strides = [1, 1, 1]} : vector<8x18x4xf32> to vector<8x16x4xf32>
    %50 = vector.shape_cast %11 : vector<4xf32> to vector<1x1x4xf32>
    %51 = vector.broadcast %50 : vector<1x1x4xf32> to vector<8x16x4xf32>
    %52 = arith.mulf %49, %51 : vector<8x16x4xf32>
    %53 = arith.addf %48, %52 : vector<8x16x4xf32>
    %54 = vector.extract_strided_slice %43 {offsets = [0, 2, 0], sizes = [8, 16, 4], strides = [1, 1, 1]} : vector<8x18x4xf32> to vector<8x16x4xf32>
    %55 = vector.shape_cast %13 : vector<4xf32> to vector<1x1x4xf32>
    %56 = vector.broadcast %55 : vector<1x1x4xf32> to vector<8x16x4xf32>
    %57 = arith.mulf %54, %56 : vector<8x16x4xf32>
    %58 = arith.addf %53, %57 : vector<8x16x4xf32>
    %c2_i32 = arith.constant 2 : i32
    %59 = arith.addi %1, %c2_i32 : i32
    %c0_30 = arith.constant 0 : index
    %60 = arith.index_cast %59 : i32 to index
    %c0_31 = arith.constant 0 : index
    %c0_32 = arith.constant 0 : index
    %61 = vector.load %arg2[%c0_30, %60, %c0_31, %c0_32] : memref<1x18x18x4xf32, #tpu.memory_space<vmem>>, vector<1x8x18x4xf32>
    %62 = vector.shape_cast %61 : vector<1x8x18x4xf32> to vector<8x18x4xf32>
    %63 = vector.extract_strided_slice %62 {offsets = [0, 0, 0], sizes = [8, 16, 4], strides = [1, 1, 1]} : vector<8x18x4xf32> to vector<8x16x4xf32>
    %64 = vector.shape_cast %15 : vector<4xf32> to vector<1x1x4xf32>
    %65 = vector.broadcast %64 : vector<1x1x4xf32> to vector<8x16x4xf32>
    %66 = arith.mulf %63, %65 : vector<8x16x4xf32>
    %67 = arith.addf %58, %66 : vector<8x16x4xf32>
    %68 = vector.extract_strided_slice %62 {offsets = [0, 1, 0], sizes = [8, 16, 4], strides = [1, 1, 1]} : vector<8x18x4xf32> to vector<8x16x4xf32>
    %69 = vector.shape_cast %17 : vector<4xf32> to vector<1x1x4xf32>
    %70 = vector.broadcast %69 : vector<1x1x4xf32> to vector<8x16x4xf32>
    %71 = arith.mulf %68, %70 : vector<8x16x4xf32>
    %72 = arith.addf %67, %71 : vector<8x16x4xf32>
    %73 = vector.extract_strided_slice %62 {offsets = [0, 2, 0], sizes = [8, 16, 4], strides = [1, 1, 1]} : vector<8x18x4xf32> to vector<8x16x4xf32>
    %74 = vector.shape_cast %19 : vector<4xf32> to vector<1x1x4xf32>
    %75 = vector.broadcast %74 : vector<1x1x4xf32> to vector<8x16x4xf32>
    %76 = arith.mulf %73, %75 : vector<8x16x4xf32>
    %77 = arith.addf %72, %76 : vector<8x16x4xf32>
    %78 = vector.shape_cast %77 : vector<8x16x4xf32> to vector<128x4xf32>
    %c0_33 = arith.constant 0 : index
    %c0_34 = arith.constant 0 : index
    %79 = vector.load %arg4[%c0_33, %c0_34] : memref<4x8xf32, #tpu.memory_space<vmem>>, vector<4x8xf32>
    %cst_35 = arith.constant dense<0.000000e+00> : vector<128x8xf32>
    %80 = tpu.matmul %78, %79, %cst_35 {dimension_numbers = #tpu.dot_dimension_numbers<[1], [0], [0], [1], [0, 0, 1, 1], [], []>} : vector<128x4xf32>, vector<4x8xf32>, vector<128x8xf32> -> vector<128x8xf32>
    %c0_36 = arith.constant 0 : index
    %c0_37 = arith.constant 0 : index
    %81 = vector.load %arg5[%c0_36, %c0_37] : memref<1x8xf32, #tpu.memory_space<vmem>>, vector<1x8xf32>
    %82 = vector.shape_cast %81 : vector<1x8xf32> to vector<8xf32>
    %83 = vector.shape_cast %82 : vector<8xf32> to vector<1x8xf32>
    %84 = vector.broadcast %83 : vector<1x8xf32> to vector<128x8xf32>
    %85 = arith.addf %80, %84 : vector<128x8xf32>
    %86 = vector.shape_cast %85 : vector<128x8xf32> to vector<8x16x8xf32>
    %c0_38 = arith.constant 0 : index
    %c0_39 = arith.constant 0 : index
    %c0_40 = arith.constant 0 : index
    %c0_41 = arith.constant 0 : index
    %87 = vector.load %arg6[%c0_38, %c0_39, %c0_40, %c0_41] : memref<1x8x16x8xf32, #tpu.memory_space<vmem>>, vector<1x8x16x8xf32>
    %88 = vector.shape_cast %87 : vector<1x8x16x8xf32> to vector<8x16x8xf32>
    %89 = vector.shape_cast %86 : vector<8x16x8xf32> to vector<1x8x16x8xf32>
    tpu.vector_store %arg6[%c0_38, %c0_39, %c0_40, %c0_41], %89 {strides = array<i32>} : memref<1x8x16x8xf32, #tpu.memory_space<vmem>>, vector<1x8x16x8xf32>,
    return
  }
  func.func @transform_0(%arg0: i32, %arg1: i32) -> (i32, i32, i32, i32) {
    %c0_i32 = arith.constant 0 : i32
    %c0_i32_0 = arith.constant 0 : i32
    %c0_i32_1 = arith.constant 0 : i32
    %c0_i32_2 = arith.constant 0 : i32
    return %arg0, %c0_i32, %c0_i32_0, %c0_i32_1 : i32, i32, i32, i32
  }
  func.func @transform_1(%arg0: i32, %arg1: i32) -> (i32, i32, i32) {
    %c0_i32 = arith.constant 0 : i32
    %c0_i32_0 = arith.constant 0 : i32
    %c0_i32_1 = arith.constant 0 : i32
    %c0_i32_2 = arith.constant 0 : i32
    return %c0_i32, %c0_i32_0, %c0_i32_1 : i32, i32, i32
  }
  func.func @transform_2(%arg0: i32, %arg1: i32) -> (i32, i32) {
    %c0_i32 = arith.constant 0 : i32
    %c0_i32_0 = arith.constant 0 : i32
    %c0_i32_1 = arith.constant 0 : i32
    return %c0_i32, %c0_i32_0 : i32, i32
  }
  func.func @transform_3(%arg0: i32, %arg1: i32) -> (i32, i32) {
    %c0_i32 = arith.constant 0 : i32
    %c0_i32_0 = arith.constant 0 : i32
    %c0_i32_1 = arith.constant 0 : i32
    return %c0_i32, %c0_i32_0 : i32, i32
  }
  func.func @transform_4(%arg0: i32, %arg1: i32) -> (i32, i32, i32, i32) {
    %c0_i32 = arith.constant 0 : i32
    %c0_i32_0 = arith.constant 0 : i32
    %c0_i32_1 = arith.constant 0 : i32
    return %arg0, %arg1, %c0_i32, %c0_i32_0 : i32, i32, i32, i32
  }
}

</mosaic_0001>

<bundles_post_ra>
// kernel: tpu_custom_call.1
= control target key start
LH: loop header
LB: loop body
LE: loop exit
PB: predicated region body
PF: predicated region fallthrough
CT: control target
= control target key end

     0   :  { %s1753_s15 = smov 0   ;;  %s1755_s16 = smov 0   ;;  %s2810_s0 = inlined_call_operand.vmem [shape: f32[2,18,18,4], index: 0, kind: input, shape index: {}]   ;;  %s2811_s1 = inlined_call_operand.vmem [shape: f32[3,3,4], index: 1, kind: input, shape index: {}]   ;;  %s2812_s2 = inlined_call_operand.vmem [shape: f32[4,8], index: 2, kind: input, shape index: {}]   ;;  %s2813_s3 = inlined_call_operand.vmem [shape: f32[1,8], index: 3, kind: input, shape index: {}]   ;;  %s2814_s4 = inlined_call_operand.vmem [shape: f32[2,16,16,8], index: 4, kind: output, shape index: {}]  }
   0x1   :  { %s1757_s17 = smov 0   ;;  %s1759_s18 = smov 0  }
   0x2   :  { %s1761_s19 = smov 0  }
   0x3 LB: > { %s23_s20 = sadd.s32 1, %s1718_s17  ;;  %s26_s21 = sadd.s32 1, %s1722_s18  ;;  %s1726_s19 = sphi %s1761_s19, %s14_s19   ;;  %s1722_s18 = sphi %s1759_s18, %s2848_s18   ;;  %s1718_s17 = sphi %s1757_s17, %s2847_s17   ;;  %s1714_s16 = sphi %s1755_s16, %s2846_s16   ;;  %s1710_s15 = sphi %s1753_s15, %s2845_s15  }
   0x4   : > { %p24_p0 = scmp.ge.s32.totalorder %s23_s20, 2  ;;  %p1496_p1 = scmp.ge.s32.totalorder %s1726_s19, 1 }
   0x5   : > { %p176_p2 = scmp.lt.s32.totalorder %s1726_s19, 5 }
   0x6   : > { %s2850_s20 = smov (%p24_p0, %s23_s20), 0  ;;  %s2852_s21 = smov (!%p24_p0, %s26_s21), %s1722_s18 }
   0x7   : > { %p177_p3 = pnand %p1496_p1, %p176_p2  ;;  %p28_p4 = scmp.ge.s32.totalorder %s2852_s21, 2 }
   0x8   : > { %p207_p5 = scmp.lt.s32.totalorder (!%p177_p3), %s1714_s16, 1  ;;  %s1509_s25 = smul.u32 (!%p177_p3), 192, %s1710_s15 }
   0x9   : > { %s2854_s21 = smov (%p28_p4, %s2852_s21), 0  ;;  %180 = sbr.rel (%p177_p3) target bundleno = 371 (0x173), region = 36 }
   0xe   : > { %v1169_v0 = vld [vmem:[%s2812_s2] sm:$0xf]  ;;  %vm1226_vm0 = vcmask 1043456   ;;  %s2856_s16 = smov (!%p207_p5, %s1714_s16), 1  ;;  %v1813_v4 = vld [vmem:[%s2811_s1 + $0x4] ss:$0 sm:$0xff] }
   0xf   : > { %1608 = vmatprep.subr.msk.mxu0 %vm1226_vm0, %v1169_v0  ;;  %1634 = vmatprep.subr.msk.mxu1 %vm1226_vm0, %v1169_v0  ;;  %s1636_s24 = smul.u32 432, %s2856_s16  ;;  %v1798_v1 = vld [vmem:[%s2811_s1 + $0x1] ss:$0 sm:$0xff]  ;;  %v1803_v2 = vld [vmem:[%s2811_s1 + $0x2] ss:$0 sm:$0xff]  ;;  %vm349_vm1 = vcmask 1046528  }
  0x10   : > { %1609 = vmatpush3.msk.msra.mxu0 %vm1226_vm0, %v1169_v0  ;;  %1635 = vmatpush3.msk.msra.mxu1 %vm1226_vm0, %v1169_v0  ;;  %v1808_v3 = vld [vmem:[%s2811_s1] ss:$0 sm:$0xff]  ;;  %v1818_v5 = vld [vmem:[%s2811_s1 + $0x5] ss:$0 sm:$0xff]  ;;  %v1829_v8 = vld [vmem:[%s2811_s1 + $0x6] ss:$0 sm:$0xff] }
  0x11   : > { %s211_s28 = scalar_lea.vmem %s2810_s0, %s1636_s24  ;;  %vm474_vm2 = vcmask 1045504   ;;  %v1843_v13 = vld [vmem:[%s2811_s1 + $0x8] ss:$0 sm:$0xff]  ;;  %v1860_v19 = vld [vmem:[%s2811_s1 + $0x9] ss:$0 sm:$0xff]  ;;  %vm1177_vm3 = vcmask 31744  }
  0x12   : > { %s1820_s13 = scalar_lea.vmem %s211_s28, %s1509_s25  ;;  %v1870_v24 = vld [vmem:[%s2811_s1 + $0xa] ss:$0 sm:$0xff]  ;;  %s1500_s30 = sshll.u32 %s2856_s16, 5  ;;  %vm1375_vm4 = vcmask 64512  }
  0x13   : > { %v237_v6 = vld [vmem:[%s1820_s13] sm:$0xff]  ;;  %v1824_v7 = vld [vmem:[%s1820_s13 + $0x8] sm:$0xff]  ;;  %v1838_v12 = vld [vmem:[%s1820_s13 + $0x18] sm:$0xff] }
  0x14   : > { %v301_v9 = vmul.f32 %v1798_v1, %v237_v6  ;;  %v1834_v10 = vmul.f32 %v1798_v1, %v1824_v7  ;;  %v426_v11 = vmul.f32 %v1803_v2, %v237_v6  ;;  %v265_v14 = vmul.f32 %v1808_v3, %v237_v6  ;;  %v1851_v16 = vld [vmem:[%s1820_s13 + $0x20] sm:$0xff]  ;;  %v1880_v29 = vld [vmem:[%s1820_s13 + $0x30] sm:$0xff]  ;;  %v1897_v38 = vld [vmem:[%s1820_s13 + $0x38] sm:$0xff] }
  0x15   : > { %v1848_v15 = vmul.f32 %v1803_v2, %v1824_v7  ;;  %v578_v17 = vmul.f32 %v1813_v4, %v1838_v12  ;;  %v614_v18 = vmul.f32 %v1818_v5, %v1838_v12  ;;  %v1865_v23 = vmul.f32 %v1818_v5, %v1851_v16  ;;  %v1900_v39 = vld [vmem:[%s1820_s13 + $0x60] sm:$0xff]  ;;  %v1915_v44 = vld [vmem:[%s1820_s13 + $0x68] sm:$0xff]  ;;  %v1947_v61 = vld [vmem:[%s1820_s13 + $0x78] sm:$0xff] }
  0x16   : > { %v350_v20 = vrot.slane %v301_v9, 1  ;;  %v351_v21 = vrot.slane %v1834_v10, 1  ;;  %v475_v22 = vrot.slane %v426_v11, 2  ;;  %v738_v27 = vmul.f32 %v1829_v8, %v1838_v12  ;;  %v1951_v6 = vld [vmem:[%s1820_s13 + $0x80] sm:$0xff] }
  0x17   : > { %v476_v25 = vrot.slane %v1848_v15, 2  ;;  %v662_v26 = vrot.slane %v614_v18, 1  ;;  %v1877_v28 = vmul.f32 %v1829_v8, %v1851_v16  ;;  %v1887_v31 = vmul.f32 %v1813_v4, %v1851_v16 }
  0x18   : > { %v352_v30 = vsel %vm349_vm1, %v350_v20, %v351_v21  ;;  %v663_v32 = vrot.slane %v1865_v23, 1  ;;  %v889_v33 = vmul.f32 %v1843_v13, %v1880_v29  ;;  %v786_v36 = vrot.slane %v738_v27, 2 }
  0x19   : > { %v406_v34 = vadd.f32 %v352_v30, %v265_v14  ;;  %v477_v35 = vsel %vm474_vm2, %v475_v22, %v476_v25  ;;  %v787_v37 = vrot.slane %v1877_v28, 2  ;;  %v1904_v40 = vmul.f32 %v1843_v13, %v1897_v38 }
  0x1a   : > { %v925_v41 = vmul.f32 %v1860_v19, %v1880_v29  ;;  %v1910_v42 = vmul.f32 %v1860_v19, %v1897_v38  ;;  %v1049_v43 = vmul.f32 %v1870_v24, %v1880_v29  ;;  %v664_v46 = vsel %vm349_vm1, %v662_v26, %v663_v32 }
  0x1b   : > { %v531_v45 = vadd.f32 %v477_v35, %v406_v34  ;;  %v788_v47 = vsel %vm474_vm2, %v786_v36, %v787_v37  ;;  %v1925_v48 = vmul.f32 %v1870_v24, %v1897_v38  ;;  %v313_v52 = vmul.f32 %v1798_v1, %v1900_v39 }
  0x1c   : > { %v973_v49 = vrot.slane %v925_v41, 1  ;;  %v2820_v50 = vrot.slane %v1910_v42, 1  ;;  %v1097_v51 = vrot.slane %v1049_v43, 2  ;;  %v1933_v55 = vmul.f32 %v1798_v1, %v1915_v44 }
  0x1d   : > { %v594_v53 = vadd.f32 %v578_v17, %v531_v45  ;;  %v2819_v54 = vrot.slane %v1925_v48, 2  ;;  %v438_v56 = vmul.f32 %v1803_v2, %v1900_v39  ;;  %v273_v58 = vmul.f32 %v1808_v3, %v1900_v39 }
  0x1e   : > { %v975_v57 = vsel %vm349_vm1, %v973_v49, %v2820_v50  ;;  %v370_v59 = vrot.slane %v313_v52, 1  ;;  %v1944_v60 = vmul.f32 %v1803_v2, %v1915_v44  ;;  %v2818_v63 = vrot.slane %v1933_v55, 1  ;;  %v1990_v52 = vld [vmem:[%s1820_s13 + $0x98] sm:$0xff] }
  0x1f   : > { %v718_v62 = vadd.f32 %v664_v46, %v594_v53  ;;  %v495_v0 = vrot.slane %v438_v56, 2  ;;  %v586_v9 = vmul.f32 %v1813_v4, %v1947_v61  ;;  %v1099_v11 = vsel %vm474_vm2, %v1097_v51, %v2819_v54  ;;  %v239_v56 = vld [vmem:[%s1820_s13 + $0x10] sm:$0x3] }
  0x20   : > { %v2817_v14 = vrot.slane %v1944_v60, 2  ;;  %v626_v17 = vmul.f32 %v1818_v5, %v1947_v61  ;;  %v1963_v18 = vmul.f32 %v1818_v5, %v1951_v6  ;;  %v372_v22 = vsel %vm349_vm1, %v370_v59, %v2818_v63 }
  0x21   : > { %v842_v20 = vadd.f32 %v788_v47, %v718_v62  ;;  %v750_v26 = vmul.f32 %v1829_v8, %v1947_v61  ;;  %v1972_v27 = vmul.f32 %v1829_v8, %v1951_v6  ;;  %v414_v30 = vadd.f32 %v372_v22, %v273_v58  ;;  %v1984_v47 = vld [vmem:[%s1820_s13 + $0x90] sm:$0xff] }
  0x22   : > { %v497_v34 = vsel %vm474_vm2, %v495_v0, %v2817_v14  ;;  %v682_v35 = vrot.slane %v626_v17, 1  ;;  %v2816_v36 = vrot.slane %v1963_v18, 1  ;;  %v1980_v43 = vmul.f32 %v1813_v4, %v1951_v6  ;;  %v1517_v17 = vld [vmem:[%s1820_s13 + $0x28] sm:$0x3] }
  0x23   : > { %v905_v41 = vadd.f32 %v889_v33, %v842_v20  ;;  %v806_v45 = vrot.slane %v750_v26, 2  ;;  %v2815_v46 = vrot.slane %v1972_v27, 2  ;;  %v539_v49 = vadd.f32 %v497_v34, %v414_v30  ;;  %v1546_v30 = vld [vmem:[%s1820_s13 + $0x40] sm:$0x3] }
  0x24   : > { %v684_v51 = vsel %vm349_vm1, %v682_v35, %v2816_v36  ;;  %v897_v33 = vmul.f32 %v1843_v13, %v1984_v47  ;;  %v937_v53 = vmul.f32 %v1860_v19, %v1984_v47  ;;  %v2002_v62 = vmul.f32 %v1860_v19, %v1990_v52 }
  0x25   : > { %v1029_v58 = vadd.f32 %v975_v57, %v905_v41  ;;  %v808_v59 = vsel %vm474_vm2, %v806_v45, %v2815_v46  ;;  %v1061_v0 = vmul.f32 %v1870_v24, %v1984_v47  ;;  %v602_v20 = vadd.f32 %v586_v9, %v539_v49 }
  0x26   : > { %v993_v22 = vrot.slane %v937_v53, 1  ;;  %v2009_v26 = vmul.f32 %v1870_v24, %v1990_v52  ;;  %v266_v57 = vmul.f32 %v1808_v3, %v1824_v7  ;;  %v994_v35 = vrot.slane %v2002_v62, 1 }
  0x27   : > { %v1153_v34 = vadd.f32 %v1099_v11, %v1029_v58  ;;  %v1117_v41 = vrot.slane %v1061_v0, 2  ;;  %v303_v45 = vmul.f32 %v1798_v1, %v239_v56  ;;  %v726_v46 = vadd.f32 %v684_v51, %v602_v20 }
  0x28   : > { %v1118_v36 = vrot.slane %v2009_v26, 2  ;;  %v428_v9 = vmul.f32 %v1803_v2, %v239_v56  ;;  %v616_v49 = vmul.f32 %v1818_v5, %v1517_v17  ;;  %v2022_v7 = vmul.f32 %v1843_v13, %v1990_v52 }
  0x29   : > { %1610 = vmatprep.mubr.msk.f32.mxu0 %vm1177_vm3, %v1153_v34  ;;  %v353_v11 = vrot.slane %v303_v45, 1  ;;  %v740_v53 = vmul.f32 %v1829_v8, %v1517_v17  ;;  %v927_v51 = vmul.f32 %v1860_v19, %v1546_v30  ;;  %v850_v58 = vadd.f32 %v808_v59, %v726_v46  ;;  %v251_v45 = vld [vmem:[%s1820_s13 + $0x70] sm:$0x3]  ;;  %v1529_v59 = vld [vmem:[%s1820_s13 + $0x88] sm:$0x3] }
  0x2a   : > { %v995_v62 = vsel %vm349_vm1, %v993_v22, %v994_v35  ;;  %v478_v0 = vrot.slane %v428_v9, 2  ;;  %v665_v56 = vrot.slane %v616_v49, 1  ;;  %v1051_v63 = vmul.f32 %v1870_v24, %v1546_v30  ;;  %v1558_v22 = vld [vmem:[%s1820_s13 + $0xa0] sm:$0x3] }
  0x2b   : > { %v354_v20 = vsel %vm349_vm1, %v351_v21, %v353_v11  ;;  %v789_v34 = vrot.slane %v740_v53, 2  ;;  %v976_v14 = vrot.slane %v927_v51, 1  ;;  %v913_v54 = vadd.f32 %v897_v33, %v850_v58 }
  0x2c   : > { %v1119_v17 = vsel %vm474_vm2, %v1117_v41, %v1118_v36  ;;  %v407_v50 = vadd.f32 %v354_v20, %v266_v57  ;;  %v479_v46 = vsel %vm474_vm2, %v476_v25, %v478_v0  ;;  %v666_v10 = vsel %vm349_vm1, %v663_v32, %v665_v56 }
  0x2d   : > { %v790_v21 = vsel %vm474_vm2, %v787_v37, %v789_v34  ;;  %v2830_v33 = vrot.slane %v1910_v42, 1  ;;  %v1100_v41 = vrot.slane %v1051_v63, 2  ;;  %v1037_v57 = vadd.f32 %v995_v62, %v913_v54 }
  0x2e   : > { %v532_v9 = vadd.f32 %v479_v46, %v407_v50  ;;  %v315_v15 = vmul.f32 %v1798_v1, %v251_v45  ;;  %v440_v25 = vmul.f32 %v1803_v2, %v251_v45  ;;  %v274_v23 = vmul.f32 %v1808_v3, %v1915_v44 }
  0x2f   : > { %v977_v30 = vsel %vm349_vm1, %v2830_v33, %v976_v14  ;;  %v628_v32 = vmul.f32 %v1818_v5, %v1529_v59  ;;  %v752_v28 = vmul.f32 %v1829_v8, %v1529_v59  ;;  %v939_v37 = vmul.f32 %v1860_v19, %v1558_v22 }
  0x30   : > { %v1161_v49 = vadd.f32 %v1119_v17, %v1037_v57  ;;  %v595_v42 = vadd.f32 %v1887_v31, %v532_v9  ;;  %v373_v14 = vrot.slane %v315_v15, 1  ;;  %v498_v63 = vrot.slane %v440_v25, 2 }
  0x31   : > { %v685_v54 = vrot.slane %v628_v32, 1  ;;  %v809_v50 = vrot.slane %v752_v28, 2  ;;  %v996_v11 = vrot.slane %v939_v37, 1  ;;  %v1063_v53 = vmul.f32 %v1870_v24, %v1558_v22 }
  0x32   : > { %1622 = vmatprep.mubr.msk.f32.mxu1 %vm1177_vm3, %v1161_v49  ;;  %v719_v51 = vadd.f32 %v666_v10, %v595_v42  ;;  %v2831_v58 = vrot.slane %v1925_v48, 2  ;;  %v2832_v0 = vrot.slane %v1933_v55, 1  ;;  %v2833_v31 = vrot.slane %v1944_v60, 2 }
  0x33   : > { %v2834_v45 = vrot.slane %v1963_v18, 1  ;;  %v2835_v46 = vrot.slane %v1972_v27, 2  ;;  %v267_v48 = vmul.f32 %v1838_v12, %v1808_v3  ;;  %v997_v55 = vsel %vm349_vm1, %v994_v35, %v996_v11  ;;  %v2115_v11 = vld [vmem:[%s1820_s13 + $0x48] sm:$0xff] }
  0x34   : > { %v1101_v62 = vsel %vm474_vm2, %v2831_v58, %v1100_v41  ;;  %v374_v56 = vsel %vm349_vm1, %v2832_v0, %v373_v14  ;;  %v499_v20 = vsel %vm474_vm2, %v2833_v31, %v498_v63  ;;  %v843_v22 = vadd.f32 %v790_v21, %v719_v51  ;;  %v2121_v0 = vld [vmem:[%s1820_s13 + $0x50] sm:$0xff] }
  0x35   : > { %v415_v34 = vadd.f32 %v374_v56, %v274_v23  ;;  %v686_v17 = vsel %vm349_vm1, %v2834_v45, %v685_v54  ;;  %v810_v59 = vsel %vm474_vm2, %v2835_v46, %v809_v50  ;;  %v304_v60 = vmul.f32 %v1838_v12, %v1798_v1 }
  0x36   : > { %v2081_v10 = vmul.f32 %v1851_v16, %v1798_v1  ;;  %v1120_v33 = vrot.slane %v1063_v53, 2  ;;  %v429_v27 = vmul.f32 %v1838_v12, %v1803_v2  ;;  %v2087_v41 = vmul.f32 %v1851_v16, %v1803_v2 }
  0x37   : > { %v540_v18 = vadd.f32 %v499_v20, %v415_v34  ;;  %v906_v21 = vadd.f32 %v1904_v40, %v843_v22  ;;  %v355_v57 = vrot.slane %v304_v60, 1  ;;  %v580_v9 = vmul.f32 %v1880_v29, %v1813_v4 }
  0x38   : > { %v356_v35 = vrot.slane %v2081_v10, 1  ;;  %v480_v25 = vrot.slane %v429_v27, 2  ;;  %v481_v23 = vrot.slane %v2087_v41, 2  ;;  %v617_v12 = vmul.f32 %v1880_v29, %v1818_v5 }
  0x39   : > { %v603_v15 = vadd.f32 %v1980_v43, %v540_v18  ;;  %v1030_v32 = vadd.f32 %v977_v30, %v906_v21  ;;  %v2102_v28 = vmul.f32 %v1897_v38, %v1818_v5  ;;  %v741_v43 = vmul.f32 %v1880_v29, %v1829_v8 }
  0x3a   : > { %v357_v40 = vsel %vm349_vm1, %v355_v57, %v356_v35  ;;  %v482_v42 = vsel %vm474_vm2, %v480_v25, %v481_v23  ;;  %v667_v14 = vrot.slane %v617_v12, 1  ;;  %v2112_v54 = vmul.f32 %v1897_v38, %v1829_v8 }
  0x3b   : > { %v727_v37 = vadd.f32 %v686_v17, %v603_v15  ;;  %v408_v49 = vadd.f32 %v357_v40, %v267_v48  ;;  %v1154_v30 = vadd.f32 %v1101_v62, %v1030_v32  ;;  %v668_v63 = vrot.slane %v2102_v28, 1 }
  0x3c   : > { %v791_v50 = vrot.slane %v741_v43, 2  ;;  %v1121_v51 = vsel %vm474_vm2, %v1118_v36, %v1120_v33  ;;  %v928_v62 = vmul.f32 %v1860_v19, %v2115_v11  ;;  %v792_v31 = vrot.slane %v2112_v54, 2 }
  0x3d   : > { %v851_v53 = vadd.f32 %v810_v59, %v727_v37  ;;  %v533_v58 = vadd.f32 %v482_v42, %v408_v49  ;;  %1611 = vmatmul.mubr.msk.f32.vlgmr.msra.gmra.mxu0 %vm1177_vm3, %v1154_v30  ;;  %v669_v56 = vsel %vm349_vm1, %v667_v14, %v668_v63  ;;  %v2132_v20 = vmul.f32 %v1860_v19, %v2121_v0 }
  0x3e   : > { %v1052_v36 = vmul.f32 %v1870_v24, %v2115_v11  ;;  %v978_v45 = vrot.slane %v928_v62, 1  ;;  %v2139_v17 = vmul.f32 %v1870_v24, %v2121_v0  ;;  %v793_v46 = vsel %vm474_vm2, %v791_v50, %v792_v31 }
  0x3f   : > { %v914_v26 = vadd.f32 %v2022_v7, %v851_v53  ;;  %v596_v34 = vadd.f32 %v580_v9, %v533_v58  ;;  %v891_v59 = vmul.f32 %v1843_v13, %v2115_v11  ;;  %v979_v48 = vrot.slane %v2132_v20, 1 }
  0x40   : > { %v1102_v22 = vrot.slane %v1052_v36, 2  ;;  %v1103_v7 = vrot.slane %v2139_v17, 2  ;;  %v316_v33 = vmul.f32 %v1947_v61, %v1798_v1  ;;  %v275_v27 = vmul.f32 %v1947_v61, %v1808_v3 }
  0x41   : > { %v1038_v60 = vadd.f32 %v997_v55, %v914_v26  ;;  %v720_v18 = vadd.f32 %v669_v56, %v596_v34  ;;  %v2154_v21 = vmul.f32 %v1951_v6, %v1798_v1  ;;  %v441_v57 = vmul.f32 %v1947_v61, %v1803_v2  ;;  %v2193_v34 = vld [vmem:[%s1820_s13 + $0xa8] sm:$0xff] }
  0x42   : > { %v2160_v9 = vmul.f32 %v1951_v6, %v1803_v2  ;;  %v980_v25 = vsel %vm349_vm1, %v978_v45, %v979_v48  ;;  %v375_v12 = vrot.slane %v316_v33, 1  ;;  %v1104_v32 = vsel %vm474_vm2, %v1102_v22, %v1103_v7  ;;  %v2196_v45 = vld [vmem:[%s1820_s13 + $0xb0] sm:$0xff] }
  0x43   : > { %v1162_v55 = vadd.f32 %v1121_v51, %v1038_v60  ;;  %v844_v15 = vadd.f32 %v793_v46, %v720_v18  ;;  %v376_v40 = vrot.slane %v2154_v21, 1  ;;  %v500_v43 = vrot.slane %v441_v57, 2  ;;  %v242_v18 = vld [vmem:[%s1820_s13 + $0x28] sm:$0x3] }
  0x44   : > { %v2825_v37 = vrot.slane %v2160_v9, 2  ;;  %v629_v42 = vmul.f32 %v1984_v47, %v1818_v5  ;;  %v2175_v14 = vmul.f32 %v1990_v52, %v1818_v5  ;;  %v753_v30 = vmul.f32 %v1984_v47, %v1829_v8 }
  0x45   : > { %1623 = vmatmul.mubr.msk.f32.vlgmr.msra.gmra.mxu1 %vm1177_vm3, %v1162_v55  ;;  %v907_v49 = vadd.f32 %v891_v59, %v844_v15  ;;  %v377_v50 = vsel %vm349_vm1, %v375_v12, %v376_v40  ;;  %v588_v51 = vmul.f32 %v1984_v47, %v1813_v4  ;;  %v2189_v58 = vmul.f32 %v1990_v52, %v1829_v8 }
  0x46   : > { %v502_v53 = vsel %vm474_vm2, %v500_v43, %v2825_v37  ;;  %v416_v56 = vadd.f32 %v377_v50, %v275_v27  ;;  %v687_v36 = vrot.slane %v629_v42, 1  ;;  %v2823_v26 = vrot.slane %v2175_v14, 1 }
  0x47   : > { %v1031_v62 = vadd.f32 %v980_v25, %v907_v49  ;;  %v811_v46 = vrot.slane %v753_v30, 2  ;;  %v2822_v59 = vrot.slane %v2189_v58, 2  ;;  %v940_v22 = vmul.f32 %v1860_v19, %v2193_v34  ;;  %v1520_v49 = vld [vmem:[%s1820_s13 + $0x40] sm:$0x3] }
  0x48   : > { %v2203_v60 = vmul.f32 %v1860_v19, %v2196_v45  ;;  %v541_v27 = vadd.f32 %v502_v53, %v416_v56  ;;  %v899_v57 = vmul.f32 %v1843_v13, %v2193_v34  ;;  %v1064_v55 = vmul.f32 %v1870_v24, %v2193_v34  ;;  %v1549_v53 = vld [vmem:[%s1820_s13 + $0x58] sm:$0x3] }
  0x49   : > { %v1155_v33 = vadd.f32 %v1104_v32, %v1031_v62  ;;  %v689_v15 = vsel %vm349_vm1, %v687_v36, %v2823_v26  ;;  %v998_v25 = vrot.slane %v940_v22, 1  ;;  %v2216_v43 = vmul.f32 %v1870_v24, %v2196_v45 }
  0x4a   : > { %v2821_v12 = vrot.slane %v2203_v60, 1  ;;  %v604_v32 = vadd.f32 %v588_v51, %v541_v27  ;;  %v813_v42 = vsel %vm474_vm2, %v811_v46, %v2822_v59  ;;  %v1122_v30 = vrot.slane %v1064_v55, 2 }
  0x4b   : > { %1613 = vmatprep.mubr.msk.f32.mxu0 %vm1177_vm3, %v1155_v33  ;;  %v306_v50 = vmul.f32 %v1798_v1, %v242_v18  ;;  %v2824_v56 = vrot.slane %v2216_v43, 2  ;;  %v268_v36 = vmul.f32 %v1851_v16, %v1808_v3  ;;  %v431_v51 = vmul.f32 %v1803_v2, %v242_v18 }
  0x4c   : > { %v1000_v62 = vsel %vm349_vm1, %v998_v25, %v2821_v12  ;;  %v728_v22 = vadd.f32 %v689_v15, %v604_v32  ;;  %v619_v46 = vmul.f32 %v1818_v5, %v1520_v49  ;;  %v743_v27 = vmul.f32 %v1829_v8, %v1520_v49 }
  0x4d   : > { %v358_v33 = vrot.slane %v306_v50, 1  ;;  %v1124_v55 = vsel %vm474_vm2, %v1122_v30, %v2824_v56  ;;  %v483_v25 = vrot.slane %v431_v51, 2  ;;  %v581_v12 = vmul.f32 %v1897_v38, %v1813_v4  ;;  %v254_v50 = vld [vmem:[%s1820_s13 + $0x88] sm:$0x3]  ;;  %v1532_v56 = vld [vmem:[%s1820_s13 + $0xa0] sm:$0x3] }
  0x4e   : > { %v930_v59 = vmul.f32 %v1860_v19, %v1549_v53  ;;  %v852_v16 = vadd.f32 %v813_v42, %v728_v22  ;;  %v670_v15 = vrot.slane %v619_v46, 1  ;;  %v794_v32 = vrot.slane %v743_v27, 2 }
  0x4f   : > { %v359_v18 = vsel %vm349_vm1, %v356_v35, %v358_v33  ;;  %v484_v49 = vsel %vm474_vm2, %v481_v23, %v483_v25  ;;  %v1054_v51 = vmul.f32 %v1870_v24, %v1549_v53  ;;  %v892_v42 = vmul.f32 %v1843_v13, %v2121_v0 }
  0x50   : > { %v409_v26 = vadd.f32 %v359_v18, %v268_v36  ;;  %v981_v30 = vrot.slane %v930_v59, 1  ;;  %v915_v37 = vadd.f32 %v899_v57, %v852_v16  ;;  %v671_v10 = vsel %vm349_vm1, %v668_v63, %v670_v15 }
  0x51   : > { %v795_v35 = vsel %vm474_vm2, %v792_v31, %v794_v32  ;;  %v1105_v36 = vrot.slane %v1054_v51, 2  ;;  %v276_v23 = vmul.f32 %v1951_v6, %v1808_v3  ;;  %v318_v59 = vmul.f32 %v1798_v1, %v254_v50  ;;  %v1561_v31 = vld [vmem:[%s1820_s13 + $0xb8] sm:$0x3] }
  0x52   : > { %v534_v41 = vadd.f32 %v484_v49, %v409_v26  ;;  %v1039_v53 = vadd.f32 %v1000_v62, %v915_v37  ;;  %v982_v28 = vsel %vm349_vm1, %v979_v48, %v981_v30  ;;  %v443_v63 = vmul.f32 %v1803_v2, %v254_v50 }
  0x53   : > { %v631_v54 = vmul.f32 %v1818_v5, %v1532_v56  ;;  %v378_v22 = vrot.slane %v318_v59, 1  ;;  %v589_v26 = vmul.f32 %v1990_v52, %v1813_v4  ;;  %v755_v33 = vmul.f32 %v1829_v8, %v1532_v56 }
  0x54   : > { %v597_v57 = vadd.f32 %v581_v12, %v534_v41  ;;  %v1163_v46 = vadd.f32 %v1124_v55, %v1039_v53  ;;  %v1106_v37 = vsel %vm474_vm2, %v1103_v7, %v1105_v36  ;;  %v503_v20 = vrot.slane %v443_v63, 2 }
  0x55   : > { %v690_v62 = vrot.slane %v631_v54, 1  ;;  %v379_v27 = vsel %vm349_vm1, %v376_v40, %v378_v22  ;;  %v814_v25 = vrot.slane %v755_v33, 2  ;;  %v942_v12 = vmul.f32 %v1860_v19, %v1561_v31 }
  0x56   : > { %v721_v48 = vadd.f32 %v671_v10, %v597_v57  ;;  %1625 = vmatprep.mubr.msk.f32.mxu1 %vm1177_vm3, %v1163_v46  ;;  %v417_v16 = vadd.f32 %v379_v27, %v276_v23  ;;  %v2836_v56 = vrot.slane %v2160_v9, 2  ;;  %v900_v17 = vmul.f32 %v1843_v13, %v2196_v45 }
  0x57   : > { %v1066_v7 = vmul.f32 %v1870_v24, %v1561_v31  ;;  %v2837_v21 = vrot.slane %v2175_v14, 1  ;;  %v2838_v15 = vrot.slane %v2189_v58, 2  ;;  %v1001_v50 = vrot.slane %v942_v12, 1 }
  0x58   : > { %v504_v55 = vsel %vm474_vm2, %v2836_v56, %v503_v20  ;;  %v845_v18 = vadd.f32 %v795_v35, %v721_v48  ;;  %v269_v9 = vmul.f32 %v1880_v29, %v1808_v3  ;;  %v307_v30 = vmul.f32 %v1880_v29, %v1798_v1 }
  0x59   : > { %v691_v40 = vsel %vm349_vm1, %v2837_v21, %v690_v62  ;;  %v815_v32 = vsel %vm474_vm2, %v2838_v15, %v814_v25  ;;  %v542_v49 = vadd.f32 %v504_v55, %v417_v16  ;;  %v2295_v51 = vmul.f32 %v1897_v38, %v1798_v1 }
  0x5a   : > { %v908_v10 = vadd.f32 %v892_v42, %v845_v18  ;;  %v1125_v14 = vrot.slane %v1066_v7, 2  ;;  %v432_v35 = vmul.f32 %v1880_v29, %v1803_v2  ;;  %v2301_v58 = vmul.f32 %v1897_v38, %v1803_v2 }
  0x5b   : > { %v605_v41 = vadd.f32 %v589_v26, %v542_v49  ;;  %v2839_v36 = vrot.slane %v2203_v60, 1  ;;  %v360_v59 = vrot.slane %v307_v30, 1  ;;  %v361_v53 = vrot.slane %v2295_v51, 1 }
  0x5c   : > { %v1032_v63 = vadd.f32 %v982_v28, %v908_v10  ;;  %v485_v54 = vrot.slane %v432_v35, 2  ;;  %v486_v42 = vrot.slane %v2301_v58, 2  ;;  %v582_v31 = vmul.f32 %v2115_v11, %v1813_v4 }
  0x5d   : > { %v1002_v23 = vsel %vm349_vm1, %v2839_v36, %v1001_v50  ;;  %v729_v29 = vadd.f32 %v691_v40, %v605_v41  ;;  %v362_v57 = vsel %vm349_vm1, %v360_v59, %v361_v53  ;;  %v620_v60 = vmul.f32 %v2115_v11, %v1818_v5 }
  0x5e   : > { %v2317_v22 = vmul.f32 %v2121_v0, %v1818_v5  ;;  %v1156_v26 = vadd.f32 %v1106_v37, %v1032_v63  ;;  %v410_v28 = vadd.f32 %v362_v57, %v269_v9  ;;  %v487_v33 = vsel %vm474_vm2, %v485_v54, %v486_v42 }
  0x5f   : > { %v744_v46 = vmul.f32 %v2115_v11, %v1829_v8  ;;  %v853_v20 = vadd.f32 %v815_v32, %v729_v29  ;;  %v672_v62 = vrot.slane %v620_v60, 1  ;;  %v2327_v27 = vmul.f32 %v2121_v0, %v1829_v8 }
  0x60   : > { %v673_v48 = vrot.slane %v2317_v22, 1  ;;  %1614 = vmatmul.mubr.msk.f32.gmra.mxu0 %vm1177_vm3, %v1156_v26  ;;  %v2840_v37 = vrot.slane %v2216_v43, 2  ;;  %v535_v12 = vadd.f32 %v487_v33, %v410_v28  ;;  %v931_v56 = vmul.f32 %v1860_v19, %v1900_v39 }
  0x61   : > { %v796_v16 = vrot.slane %v744_v46, 2  ;;  %v916_v55 = vadd.f32 %v900_v17, %v853_v20  ;;  %v797_v18 = vrot.slane %v2327_v27, 2  ;;  %v2341_v21 = vmul.f32 %v1860_v19, %v1915_v44 }
  0x62   : > { %v1126_v25 = vsel %vm474_vm2, %v2840_v37, %v1125_v14  ;;  %v674_v7 = vsel %vm349_vm1, %v672_v62, %v673_v48  ;;  %v598_v40 = vadd.f32 %v582_v31, %v535_v12  ;;  %v983_v43 = vrot.slane %v931_v56, 1 }
  0x63   : > { %v1055_v15 = vmul.f32 %v1870_v24, %v1900_v39  ;;  %v2347_v32 = vmul.f32 %v1870_v24, %v1915_v44  ;;  %v1040_v17 = vadd.f32 %v1002_v23, %v916_v55  ;;  %v798_v50 = vsel %vm474_vm2, %v796_v16, %v797_v18 }
  0x64   : > { %v893_v49 = vmul.f32 %v1843_v13, %v1900_v39  ;;  %v984_v9 = vrot.slane %v2341_v21, 1  ;;  %v722_v30 = vadd.f32 %v674_v7, %v598_v40  ;;  %v319_v35 = vmul.f32 %v1984_v47, %v1798_v1  ;;  %v2401_v40 = vld [vmem:[%s1820_s13 + $0xc0] sm:$0xff] }
  0x65   : > { %v1107_v10 = vrot.slane %v1055_v15, 2  ;;  %v1108_v14 = vrot.slane %v2347_v32, 2  ;;  %v1164_v41 = vadd.f32 %v1126_v25, %v1040_v17  ;;  %v277_v36 = vmul.f32 %v1984_v47, %v1808_v3 }
  0x66   : > { %v2362_v23 = vmul.f32 %v1990_v52, %v1798_v1  ;;  %v444_v59 = vmul.f32 %v1984_v47, %v1803_v2  ;;  %v846_v63 = vadd.f32 %v798_v50, %v722_v30  ;;  %v985_v54 = vsel %vm349_vm1, %v983_v43, %v984_v9  ;;  %v2404_v43 = vld [vmem:[%s1820_s13 + $0xc8] sm:$0xff]  ;;  %v245_v30 = vld [vmem:[%s1820_s13 + $0x40] sm:$0x3] }
  0x67   : > { %v380_v31 = vrot.slane %v319_v35, 1  ;;  %v2371_v29 = vmul.f32 %v1990_v52, %v1803_v2  ;;  %1626 = vmatmul.mubr.msk.f32.gmra.mxu1 %vm1177_vm3, %v1164_v41  ;;  %v1109_v57 = vsel %vm474_vm2, %v1107_v10, %v1108_v14  ;;  %v632_v26 = vmul.f32 %v2193_v34, %v1818_v5 }
  0x68   : > { %v381_v60 = vrot.slane %v2362_v23, 1  ;;  %v505_v47 = vrot.slane %v444_v59, 2  ;;  %v909_v28 = vadd.f32 %v893_v49, %v846_v63  ;;  %v2383_v46 = vmul.f32 %v2196_v45, %v1818_v5 }
  0x69   : > { %v506_v33 = vrot.slane %v2371_v29, 2  ;;  %v756_v20 = vmul.f32 %v2193_v34, %v1829_v8  ;;  %v590_v37 = vmul.f32 %v2193_v34, %v1813_v4  ;;  %v692_v25 = vrot.slane %v632_v26, 1 }
  0x6a   : > { %v382_v62 = vsel %vm349_vm1, %v380_v31, %v381_v60  ;;  %v2394_v12 = vmul.f32 %v2196_v45, %v1829_v8  ;;  %v1033_v16 = vadd.f32 %v985_v54, %v909_v28  ;;  %v2829_v7 = vrot.slane %v2383_v46, 1 }
  0x6b   : > { %v418_v56 = vadd.f32 %v382_v62, %v277_v36  ;;  %v507_v55 = vsel %vm474_vm2, %v505_v47, %v506_v33  ;;  %v816_v15 = vrot.slane %v756_v20, 2  ;;  %v943_v50 = vmul.f32 %v1860_v19, %v2401_v40  ;;  %v1523_v47 = vld [vmem:[%s1820_s13 + $0x58] sm:$0x3]  ;;  %v1552_v62 = vld [vmem:[%s1820_s13 + $0x70] sm:$0x3] }
  0x6c   : > { %v2827_v17 = vrot.slane %v2394_v12, 2  ;;  %v2411_v49 = vmul.f32 %v1860_v19, %v2404_v43  ;;  %v1157_v10 = vadd.f32 %v1109_v57, %v1033_v16  ;;  %v901_v41 = vmul.f32 %v1843_v13, %v2401_v40 }
  0x6d   : > { %v543_v35 = vadd.f32 %v507_v55, %v418_v56  ;;  %v1067_v36 = vmul.f32 %v1870_v24, %v2401_v40  ;;  %v694_v59 = vsel %vm349_vm1, %v692_v25, %v2829_v7  ;;  %v1003_v63 = vrot.slane %v943_v50, 1 }
  0x6e   : > { %v2826_v54 = vrot.slane %v2411_v49, 1  ;;  %v2424_v31 = vmul.f32 %v1870_v24, %v2404_v43  ;;  %1616 = vmatprep.mubr.msk.f32.mxu0 %vm1177_vm3, %v1157_v10  ;;  %v818_v26 = vsel %vm474_vm2, %v816_v15, %v2827_v17  ;;  %v309_v20 = vmul.f32 %v1798_v1, %v245_v30 }
  0x6f   : > { %v606_v57 = vadd.f32 %v590_v37, %v543_v35  ;;  %v1127_v28 = vrot.slane %v1067_v36, 2  ;;  %v270_v56 = vmul.f32 %v1897_v38, %v1808_v3  ;;  %v434_v37 = vmul.f32 %v1803_v2, %v245_v30 }
  0x70   : > { %v1005_v25 = vsel %vm349_vm1, %v1003_v63, %v2826_v54  ;;  %v2828_v16 = vrot.slane %v2424_v31, 2  ;;  %v363_v50 = vrot.slane %v309_v20, 1  ;;  %v622_v15 = vmul.f32 %v1818_v5, %v1523_v47  ;;  %v257_v20 = vld [vmem:[%s1820_s13 + $0xa0] sm:$0x3] }
  0x71   : > { %v730_v55 = vadd.f32 %v694_v59, %v606_v57  ;;  %v746_v10 = vmul.f32 %v1829_v8, %v1523_v47  ;;  %v488_v36 = vrot.slane %v434_v37, 2  ;;  %v583_v63 = vmul.f32 %v2121_v0, %v1813_v4 }
  0x72   : > { %v1129_v35 = vsel %vm474_vm2, %v1127_v28, %v2828_v16  ;;  %v933_v54 = vmul.f32 %v1860_v19, %v1552_v62  ;;  %v364_v30 = vsel %vm349_vm1, %v361_v53, %v363_v50  ;;  %v675_v59 = vrot.slane %v622_v15, 1  ;;  %v1535_v16 = vld [vmem:[%s1820_s13 + $0xb8] sm:$0x3] }
  0x73   : > { %v854_v38 = vadd.f32 %v818_v26, %v730_v55  ;;  %v799_v57 = vrot.slane %v746_v10, 2  ;;  %v411_v17 = vadd.f32 %v364_v30, %v270_v56  ;;  %v489_v47 = vsel %vm474_vm2, %v486_v42, %v488_v36 }
  0x74   : > { %v986_v28 = vrot.slane %v933_v54, 1  ;;  %v1057_v37 = vmul.f32 %v1870_v24, %v1552_v62  ;;  %v676_v51 = vsel %vm349_vm1, %v673_v48, %v675_v59  ;;  %v894_v26 = vmul.f32 %v1843_v13, %v1915_v44 }
  0x75   : > { %v917_v7 = vadd.f32 %v901_v41, %v854_v38  ;;  %v800_v53 = vsel %vm474_vm2, %v797_v18, %v799_v57  ;;  %v536_v58 = vadd.f32 %v489_v47, %v411_v17  ;;  %v278_v42 = vmul.f32 %v1990_v52, %v1808_v3  ;;  %v1564_v18 = vld [vmem:[%s1820_s13 + $0xd0] sm:$0x3] }
  0x76   : > { %v1110_v56 = vrot.slane %v1057_v37, 2  ;;  %v321_v54 = vmul.f32 %v1798_v1, %v257_v20  ;;  %v987_v22 = vsel %vm349_vm1, %v984_v9, %v986_v28  ;;  %v446_v48 = vmul.f32 %v1803_v2, %v257_v20 }
  0x77   : > { %v1041_v62 = vadd.f32 %v1005_v25, %v917_v7  ;;  %v634_v27 = vmul.f32 %v1818_v5, %v1535_v16  ;;  %v599_v41 = vadd.f32 %v583_v63, %v536_v58  ;;  %v591_v17 = vmul.f32 %v2196_v45, %v1813_v4 }
  0x78   : > { %v383_v55 = vrot.slane %v321_v54, 1  ;;  %v758_v50 = vmul.f32 %v1829_v8, %v1535_v16  ;;  %v1111_v7 = vsel %vm474_vm2, %v1108_v14, %v1110_v56  ;;  %v508_v21 = vrot.slane %v446_v48, 2 }
  0x79   : > { %v1165_v52 = vadd.f32 %v1129_v35, %v1041_v62  ;;  %v695_v25 = vrot.slane %v634_v27, 1  ;;  %v723_v9 = vadd.f32 %v676_v51, %v599_v41  ;;  %v945_v36 = vmul.f32 %v1860_v19, %v1564_v18 }
  0x7a   : > { %v384_v15 = vsel %vm349_vm1, %v381_v60, %v383_v55  ;;  %v819_v10 = vrot.slane %v758_v50, 2  ;;  %v509_v16 = vsel %vm474_vm2, %v506_v33, %v508_v21  ;;  %v902_v32 = vmul.f32 %v1843_v13, %v2404_v43 }
  0x7b   : > { %1628 = vmatprep.mubr.msk.f32.mxu1 %vm1177_vm3, %v1165_v52  ;;  %v419_v63 = vadd.f32 %v384_v15, %v278_v42  ;;  %v1069_v14 = vmul.f32 %v1870_v24, %v1564_v18  ;;  %v847_v35 = vadd.f32 %v800_v53, %v723_v9  ;;  %v2841_v23 = vrot.slane %v2383_v46, 1 }
  0x7c   : > { %v2842_v38 = vrot.slane %v2394_v12, 2  ;;  %v1006_v59 = vrot.slane %v945_v36, 1  ;;  %v271_v29 = vmul.f32 %v2115_v11, %v1808_v3  ;;  %v310_v33 = vmul.f32 %v2115_v11, %v1798_v1 }
  0x7d   : > { %v696_v60 = vsel %vm349_vm1, %v2841_v23, %v695_v25  ;;  %v544_v57 = vadd.f32 %v509_v16, %v419_v63  ;;  %v2503_v20 = vmul.f32 %v2121_v0, %v1798_v1  ;;  %v910_v47 = vadd.f32 %v894_v26, %v847_v35  ;;  %v2567_v35 = vld [vmem:[%s2811_s1 + $0x1] ss:$0 sm:$0xff]  ;;  %v2574_v23 = vld [vmem:[%s2811_s1] ss:$0 sm:$0xff] }
  0x7e   : > { %v820_v30 = vsel %vm474_vm2, %v2842_v38, %v819_v10  ;;  %v1130_v46 = vrot.slane %v1069_v14, 2  ;;  %v435_v28 = vmul.f32 %v2115_v11, %v1803_v2  ;;  %v2509_v12 = vmul.f32 %v2121_v0, %v1803_v2 }
  0x7f   : > { %v607_v37 = vadd.f32 %v591_v17, %v544_v57  ;;  %v2843_v51 = vrot.slane %v2411_v49, 1  ;;  %v365_v53 = vrot.slane %v310_v33, 1  ;;  %v366_v58 = vrot.slane %v2503_v20, 1 }
  0x80   : > { %v1034_v56 = vadd.f32 %v987_v22, %v910_v47  ;;  %v490_v1 = vrot.slane %v435_v28, 2  ;;  %v491_v26 = vrot.slane %v2509_v12, 2  ;;  %v584_v42 = vmul.f32 %v1813_v4, %v1900_v39 }
  0x81   : > { %v1007_v3 = vsel %vm349_vm1, %v2843_v51, %v1006_v59  ;;  %v731_v11 = vadd.f32 %v696_v60, %v607_v37  ;;  %v367_v2 = vsel %vm349_vm1, %v365_v53, %v366_v58  ;;  %v623_v49 = vmul.f32 %v1818_v5, %v1900_v39  ;;  %v2585_v60 = vld [vmem:[%s2811_s1 + $0x2] ss:$0 sm:$0xff]  ;;  %v2616_v53 = vld [vmem:[%s2811_s1 + $0x6] ss:$0 sm:$0xff] }
  0x82   : > { %v2525_v54 = vmul.f32 %v1818_v5, %v1915_v44  ;;  %v1158_v62 = vadd.f32 %v1111_v7, %v1034_v56  ;;  %v412_v22 = vadd.f32 %v367_v2, %v271_v29  ;;  %v492_v48 = vsel %vm474_vm2, %v490_v1, %v491_v26  ;;  %v1565_v1 = vld [vmem:[%s1820_s13 + $0xd8] sm:$0xff]  ;;  %v2630_v2 = vld [vmem:[%s2811_s1 + $0x4] ss:$0 sm:$0xff] }
  0x83   : > { %v747_v4 = vmul.f32 %v1829_v8, %v1900_v39  ;;  %v855_v27 = vadd.f32 %v820_v30, %v731_v11  ;;  %v677_v18 = vrot.slane %v623_v49, 1  ;;  %v2535_v55 = vmul.f32 %v1829_v8, %v1915_v44 }
  0x84   : > { %v678_v41 = vrot.slane %v2525_v54, 1  ;;  %1617 = vmatmul.mubr.msk.f32.gmra.mxu0 %vm1177_vm3, %v1158_v62  ;;  %v2844_v5 = vrot.slane %v2424_v31, 2  ;;  %v537_v50 = vadd.f32 %v492_v48, %v412_v22  ;;  %v934_v7 = vmul.f32 %v1860_v19, %v1947_v61 }
  0x85   : > { %v801_v52 = vrot.slane %v747_v4, 2  ;;  %v918_v39 = vadd.f32 %v902_v32, %v855_v27  ;;  %v802_v25 = vrot.slane %v2535_v55, 2  ;;  %v2549_v8 = vmul.f32 %v1860_v19, %v1951_v6 }
  0x86   : > { %v1131_v17 = vsel %vm474_vm2, %v2844_v5, %v1130_v46  ;;  %v679_v21 = vsel %vm349_vm1, %v677_v18, %v678_v41  ;;  %v600_v44 = vadd.f32 %v584_v42, %v537_v50  ;;  %v988_v31 = vrot.slane %v934_v7, 1  ;;  %v2604_v46 = vld [vmem:[%s2811_s1 + $0x5] ss:$0 sm:$0xff]  ;;  %v248_v7 = vld [vmem:[%s1820_s13 + $0x58] sm:$0x3] }
  0x87   : > { %v1058_v9 = vmul.f32 %v1870_v24, %v1947_v61  ;;  %v2555_v15 = vmul.f32 %v1870_v24, %v1951_v6  ;;  %v1042_v10 = vadd.f32 %v1007_v3, %v918_v39  ;;  %v803_v36 = vsel %vm474_vm2, %v801_v52, %v802_v25  ;;  %v2622_v42 = vld [vmem:[%s1820_s13 + $0xe0] sm:$0xff] }
  0x88   : > { %v895_v63 = vmul.f32 %v1843_v13, %v1947_v61  ;;  %v989_v19 = vrot.slane %v2549_v8, 1  ;;  %v724_v16 = vadd.f32 %v679_v21, %v600_v44  ;;  %v322_v24 = vmul.f32 %v2567_v35, %v2193_v34  ;;  %v2657_v44 = vld [vmem:[%s2811_s1 + $0xa] ss:$0 sm:$0xff] }
  0x89   : > { %v1112_v32 = vrot.slane %v1058_v9, 2  ;;  %v1113_v14 = vrot.slane %v2555_v15, 2  ;;  %v1166_v6 = vadd.f32 %v1131_v17, %v1042_v10  ;;  %v279_v13 = vmul.f32 %v2574_v23, %v2193_v34 }
  0x8a   : > { %v2580_v61 = vmul.f32 %v2567_v35, %v2196_v45  ;;  %v447_v38 = vmul.f32 %v2585_v60, %v2193_v34  ;;  %v848_v30 = vadd.f32 %v803_v36, %v724_v16  ;;  %v990_v59 = vsel %vm349_vm1, %v988_v31, %v989_v19  ;;  %v2669_v36 = vld [vmem:[%s2811_s1 + $0x8] ss:$0 sm:$0xff] }
  0x8b   : > { %v385_v57 = vrot.slane %v322_v24, 1  ;;  %v2594_v29 = vmul.f32 %v2585_v60, %v2196_v45  ;;  %1629 = vmatmul.mubr.msk.f32.gmra.mxu1 %vm1177_vm3, %v1166_v6  ;;  %v1114_v33 = vsel %vm474_vm2, %v1112_v32, %v1113_v14  ;;  %v635_v28 = vmul.f32 %v2604_v46, %v2401_v40  ;;  %v1526_v32 = vld [vmem:[%s1820_s13 + $0x70] sm:$0x3] }
  0x8c   : > { %v386_v34 = vrot.slane %v2580_v61, 1  ;;  %v510_v47 = vrot.slane %v447_v38, 2  ;;  %v911_v37 = vadd.f32 %v895_v63, %v848_v30  ;;  %v2611_v3 = vmul.f32 %v2604_v46, %v2404_v43 }
  0x8d   : > { %v511_v51 = vrot.slane %v2594_v29, 2  ;;  %v759_v56 = vmul.f32 %v2616_v53, %v2401_v40  ;;  %v592_v49 = vmul.f32 %v2630_v2, %v2401_v40  ;;  %v697_v62 = vrot.slane %v635_v28, 1  ;;  %v2646_v40 = vld [vmem:[%s2811_s1 + $0x9] ss:$0 sm:$0xff] }
  0x8e   : > { %v387_v11 = vsel %vm349_vm1, %v385_v57, %v386_v34  ;;  %v2636_v22 = vmul.f32 %v2616_v53, %v2404_v43  ;;  %v1035_v48 = vadd.f32 %v990_v59, %v911_v37  ;;  %v698_v18 = vrot.slane %v2611_v3, 1 }
  0x8f   : > { %v420_v4 = vadd.f32 %v387_v11, %v279_v13  ;;  %v512_v27 = vsel %vm474_vm2, %v510_v47, %v511_v51  ;;  %v821_v5 = vrot.slane %v759_v56, 2  ;;  %v946_v50 = vmul.f32 %v2646_v40, %v1565_v1  ;;  %v1555_v11 = vld [vmem:[%s1820_s13 + $0x88] sm:$0x3] }
  0x90   : > { %v822_v17 = vrot.slane %v2636_v22, 2  ;;  %v2651_v52 = vmul.f32 %v2646_v40, %v2622_v42  ;;  %v1159_v39 = vadd.f32 %v1114_v33, %v1035_v48  ;;  %v1070_v31 = vmul.f32 %v2657_v44, %v1565_v1 }
  0x91   : > { %v545_v21 = vadd.f32 %v512_v27, %v420_v4  ;;  %v699_v9 = vsel %vm349_vm1, %v697_v62, %v698_v18  ;;  %v903_v63 = vmul.f32 %v2669_v36, %v1565_v1  ;;  %v2674_v16 = vmul.f32 %v2657_v44, %v2622_v42  ;;  %v260_v4 = vld [vmem:[%s1820_s13 + $0xb8] sm:$0x3] }
  0x92   : > { %v823_v10 = vsel %vm474_vm2, %v821_v5, %v822_v17  ;;  %1619 = vmatprep.mubr.msk.f32.mxu0 %vm1177_vm3, %v1159_v39  ;;  %v1008_v6 = vrot.slane %v946_v50, 1  ;;  %v1009_v13 = vrot.slane %v2651_v52, 1  ;;  %v312_v38 = vmul.f32 %v2567_v35, %v248_v7  ;;  %v1686_v50 = vld [vmem:[%s1820_s13 + $0x68] sm:$0xff]  ;;  %v1538_v39 = vld [vmem:[%s1820_s13 + $0xd0] sm:$0x3] }
  0x93   : > { %v608_v24 = vadd.f32 %v592_v49, %v545_v21  ;;  %v1132_v30 = vrot.slane %v1070_v31, 2  ;;  %v1133_v59 = vrot.slane %v2674_v16, 2  ;;  %v272_v57 = vmul.f32 %v2574_v23, %v2121_v0 }
  0x94   : > { %v437_v33 = vmul.f32 %v2585_v60, %v248_v7  ;;  %v368_v28 = vrot.slane %v312_v38, 1  ;;  %v625_v37 = vmul.f32 %v2604_v46, %v1526_v32  ;;  %v749_v56 = vmul.f32 %v2616_v53, %v1526_v32 }
  0x95   : > { %v732_v47 = vadd.f32 %v699_v9, %v608_v24  ;;  %v1010_v0 = vsel %vm349_vm1, %v1008_v6, %v1009_v13  ;;  %v585_v7 = vmul.f32 %v1686_v50, %v2630_v2  ;;  %v1134_v20 = vsel %vm474_vm2, %v1132_v30, %v1133_v59 }
  0x96   : > { %v493_v1 = vrot.slane %v437_v33, 2  ;;  %v369_v62 = vsel %vm349_vm1, %v366_v58, %v368_v28  ;;  %v680_v48 = vrot.slane %v625_v37, 1  ;;  %v804_v58 = vrot.slane %v749_v56, 2  ;;  %v1687_v37 = vld [vmem:[%s1820_s13 + $0x80] sm:$0xff] }
  0x97   : > { %v856_v49 = vadd.f32 %v823_v10, %v732_v47  ;;  %v413_v27 = vadd.f32 %v369_v62, %v272_v57  ;;  %v936_v31 = vmul.f32 %v2646_v40, %v1555_v11  ;;  %v324_v10 = vmul.f32 %v2567_v35, %v260_v4  ;;  %v1567_v35 = vld [vmem:[%s1820_s13 + $0xe8] sm:$0x3]  ;;  %s1498_s13 = sshll.u32 %s1710_s15, 3 }
  0x98   : > { %v494_v5 = vsel %vm474_vm2, %v491_v26, %v493_v1  ;;  %v681_v12 = vsel %vm349_vm1, %v678_v41, %v680_v48  ;;  %v1060_v26 = vmul.f32 %v2657_v44, %v1555_v11  ;;  %v449_v24 = vmul.f32 %v2585_v60, %v260_v4  ;;  %p215_p6 = scmp.lt.s32.totalorder %s1498_s13, 15 }
  0x99   : > { %v919_v21 = vadd.f32 %v903_v63, %v856_v49  ;;  %v538_v9 = vadd.f32 %v494_v5, %v413_v27  ;;  %v280_v63 = vmul.f32 %v2574_v23, %v2196_v45  ;;  %v637_v6 = vmul.f32 %v2604_v46, %v1538_v39 }
  0x9a   : > { %v388_v30 = vrot.slane %v324_v10, 1  ;;  %v761_v57 = vmul.f32 %v2616_v53, %v1538_v39  ;;  %v805_v41 = vsel %vm474_vm2, %v802_v25, %v804_v58  ;;  %v991_v33 = vrot.slane %v936_v31, 1  ;;  %s2858_s13 = smov (!%p215_p6, %s1498_s13), 15 }
  0x9b   : > { %v1043_v32 = vadd.f32 %v1010_v0, %v919_v21  ;;  %v601_v38 = vadd.f32 %v585_v7, %v538_v9  ;;  %v513_v47 = vrot.slane %v449_v24, 2  ;;  %v896_v45 = vmul.f32 %v1687_v37, %v2669_v36  ;;  %s1499_s29 = sshll.u32 %s2858_s13, 1 }
  0x9c   : > { %v389_v23 = vsel %vm349_vm1, %v386_v34, %v388_v30  ;;  %v700_v60 = vrot.slane %v637_v6, 1  ;;  %v1115_v46 = vrot.slane %v1060_v26, 2  ;;  %v593_v25 = vmul.f32 %v2630_v2, %v2404_v43  ;;  %s219_s5 = sadd.s32 %s1500_s30, %s1499_s29 }
  0x9d   : > { %v1167_v54 = vadd.f32 %v1134_v20, %v1043_v32  ;;  %v725_v28 = vadd.f32 %v681_v12, %v601_v38  ;;  %v421_v53 = vadd.f32 %v389_v23, %v280_v63  ;;  %v514_v55 = vsel %vm474_vm2, %v511_v51, %v513_v47  ;;  %s1501_s6 = sshll.u32 %s219_s5, 3 }
  0x9e   : > { %v824_v1 = vrot.slane %v761_v57, 2  ;;  %v948_v11 = vmul.f32 %v2646_v40, %v1567_v35  ;;  %v992_v61 = vsel %vm349_vm1, %v989_v19, %v991_v33  ;;  %v701_v62 = vsel %vm349_vm1, %v698_v18, %v700_v60  ;;  %s2761_s11 = scalar_lea.vmem %s2814_s4, %s1501_s6 }
  0x9f   : > { %1631 = vmatprep.mubr.msk.f32.mxu1 %vm1177_vm3, %v1167_v54  ;;  %v849_v56 = vadd.f32 %v805_v41, %v725_v28  ;;  %v546_v34 = vadd.f32 %v514_v55, %v421_v53  ;;  %v1072_v29 = vmul.f32 %v2657_v44, %v1567_v35  ;;  %v1116_v43 = vsel %vm474_vm2, %v1113_v14, %v1115_v46 }
  0xa0   : > { %v825_v8 = vsel %vm474_vm2, %v822_v17, %v824_v1  ;;  %v1011_v19 = vrot.slane %v948_v11, 1  ;;  %v904_v3 = vmul.f32 %v2669_v36, %v2622_v42  ;;  %v1571_v42 = vld [vmem:[%s2813_s3] ss:$0 sm:$0xff] }
  0xa1   : > { %v912_v49 = vadd.f32 %v896_v45, %v849_v56  ;;  %v609_v51 = vadd.f32 %v593_v25, %v546_v34  ;;  %v1135_v48 = vrot.slane %v1072_v29, 2 }
  0xa2   : > { %v1012_v15 = vsel %vm349_vm1, %v1009_v13, %v1011_v19 }
  0xa3   : > { %v1036_v2 = vadd.f32 %v992_v61, %v912_v49  ;;  %v733_v40 = vadd.f32 %v701_v62, %v609_v51  ;;  %v1136_v22 = vsel %vm474_vm2, %v1133_v59, %v1135_v48 }
  0xa5   : > { %v1160_v18 = vadd.f32 %v1116_v43, %v1036_v2  ;;  %v857_v44 = vadd.f32 %v825_v8, %v733_v40 }
  0xa7   : > { %1620 = vmatmul.mubr.msk.f32.gmra.mxu0 %vm1177_vm3, %v1160_v18  ;;  %v920_v14 = vadd.f32 %v904_v3, %v857_v44 }
  0xa9   : > { %v1044_v17 = vadd.f32 %v1012_v15, %v920_v14 }
  0xab   : > { %v1168_v4 = vadd.f32 %v1136_v22, %v1044_v17 }
  0xad   : > { %1632 = vmatmul.mubr.msk.f32.gmra.mxu1 %vm1177_vm3, %v1168_v4 }
  0xfd   : > { %v1612_v52 = vpop.f32.mrf.mxu0 }
  0xfe   : > { %v1302_v36 = vadd.f32 %v1612_v52, %v1571_v42 }
  0xff   : > { %v1296_v16 = vpop.f32.mrf.mxu0 }
 0x100   : > { %1377 = vst.msk [vmem:[%s2761_s11 + $0x8] sm:$0xff] %vm1375_vm4, %v1302_v36  ;;  %v1297_v13 = vadd.f32 %v1571_v42, %v1296_v16 }
 0x102   : > { %1376 = vst.msk [vmem:[%s2761_s11] sm:$0xff] %vm1375_vm4, %v1297_v13 }
 0x105   : > { %v1624_v59 = vpop.f32.mrf.mxu1 }
 0x106   : > { %v1342_v0 = vadd.f32 %v1624_v59, %v1571_v42 }
 0x107   : > { %v1336_v27 = vpop.f32.mrf.mxu1 }
 0x108   : > { %1385 = vst.msk [vmem:[%s2761_s11 + $0x48] sm:$0xff] %vm1375_vm4, %v1342_v0  ;;  %v1337_v5 = vadd.f32 %v1571_v42, %v1336_v27 }
 0x10a   : > { %1384 = vst.msk [vmem:[%s2761_s11 + $0x40] sm:$0xff] %vm1375_vm4, %v1337_v5 }
 0x120   : > { %v1615_v50 = vpop.f32.mrf.mxu0 }
 0x121   : > { %v1312_v7 = vadd.f32 %v1615_v50, %v1571_v42 }
 0x122   : > { %v1306_v39 = vpop.f32.mrf.mxu0 }
 0x123   : > { %1379 = vst.msk [vmem:[%s2761_s11 + $0x18] sm:$0xff] %vm1375_vm4, %v1312_v7  ;;  %v1307_v21 = vadd.f32 %v1571_v42, %v1306_v39 }
 0x125   : > { %1378 = vst.msk [vmem:[%s2761_s11 + $0x10] sm:$0xff] %vm1375_vm4, %v1307_v21 }
 0x127   : > { %v1627_v20 = vpop.f32.mrf.mxu1 }
 0x128   : > { %v1352_v58 = vadd.f32 %v1627_v20, %v1571_v42 }
 0x129   : > { %v1346_v31 = vpop.f32.mrf.mxu1 }
 0x12a   : > { %1387 = vst.msk [vmem:[%s2761_s11 + $0x58] sm:$0xff] %vm1375_vm4, %v1352_v58  ;;  %v1347_v9 = vadd.f32 %v1571_v42, %v1346_v31 }
 0x12c   : > { %1386 = vst.msk [vmem:[%s2761_s11 + $0x50] sm:$0xff] %vm1375_vm4, %v1347_v9 }
 0x144   : > { %v1618_v12 = vpop.f32.mrf.mxu0 }
 0x145   : > { %v1322_v26 = vadd.f32 %v1618_v12, %v1571_v42 }
 0x146   : > { %v1316_v10 = vpop.f32.mrf.mxu0 }
 0x147   : > { %1381 = vst.msk [vmem:[%s2761_s11 + $0x28] sm:$0xff] %vm1375_vm4, %v1322_v26  ;;  %v1317_v32 = vadd.f32 %v1571_v42, %v1316_v10 }
 0x149   : > { %1380 = vst.msk [vmem:[%s2761_s11 + $0x20] sm:$0xff] %vm1375_vm4, %v1317_v32 }
 0x14b   : > { %v1630_v63 = vpop.f32.mrf.mxu1 }
 0x14c   : > { %v1362_v24 = vadd.f32 %v1630_v63, %v1571_v42 }
 0x14d   : > { %v1356_v6 = vpop.f32.mrf.mxu1 }
 0x14e   : > { %1389 = vst.msk [vmem:[%s2761_s11 + $0x68] sm:$0xff] %vm1375_vm4, %v1362_v24  ;;  %v1357_v38 = vadd.f32 %v1571_v42, %v1356_v6 }
 0x150   : > { %1388 = vst.msk [vmem:[%s2761_s11 + $0x60] sm:$0xff] %vm1375_vm4, %v1357_v38 }
 0x167   : > { %v1621_v30 = vpop.f32.mrf.mxu0 }
 0x168   : > { %v1332_v57 = vadd.f32 %v1621_v30, %v1571_v42 }
 0x169   : > { %v1326_v54 = vpop.f32.mrf.mxu0 }
 0x16a   : > { %1383 = vst.msk [vmem:[%s2761_s11 + $0x38] sm:$0xff] %vm1375_vm4, %v1332_v57  ;;  %v1327_v41 = vadd.f32 %v1571_v42, %v1326_v54 }
 0x16c   : > { %1382 = vst.msk [vmem:[%s2761_s11 + $0x30] sm:$0xff] %vm1375_vm4, %v1327_v41 }
 0x16d   : > { %v1633_v33 = vpop.f32.mrf.mxu1 }
 0x16e   : > { %v1372_v47 = vadd.f32 %v1633_v33, %v1571_v42 }
 0x16f   : > { %v1366_v35 = vpop.f32.mrf.mxu1 }
 0x170   : > { %1391 = vst.msk [vmem:[%s2761_s11 + $0x78] sm:$0xff] %vm1375_vm4, %v1372_v47  ;;  %v1367_v28 = vadd.f32 %v1571_v42, %v1366_v35 }
 0x172   : > { %1390 = vst.msk [vmem:[%s2761_s11 + $0x70] sm:$0xff] %vm1375_vm4, %v1367_v28 }
 0x173 PF: > { %s14_s19 = sadd.s32 1, %s1726_s19   ;;  %s2845_s15 = smov %s1718_s17 }
 0x174   : > { %p11_p7 = scmp.ge.s32.totalorder %s14_s19, 6   ;;  %s2846_s16 = smov %s1722_s18 }
 0x175   : > { %s2847_s17 = smov %s2850_s20  ;;  %s2848_s18 = smov %s2854_s21 }
 0x176   :  { %13 = sbr.rel (!%p11_p7) target bundleno = 3 (0x3), region = 71 }

</bundles_post_ra>
